<compile_context>
chip_gen: v5e
topology: v5e:2x2
jax: 0.10.0
libtpu: 0.0.40
codegen_flags: <defaults>
</compile_context>

<pallas_src>
import jax
import jax.numpy as jnp
from jax.experimental import pallas as pl
from jax.experimental.pallas import tpu as pltpu


_MIB = 1024 * 1024


def _round_up(a: int, b: int) -> int:
    return (a + b - 1) // b * b


def _sublane_quantum(dtype) -> int:
    """Minimum second-minor tile for this dtype (f32: 8, bf16: 16, int8/fp8: 32)."""
    return {4: 8, 2: 16, 1: 32}[jnp.dtype(dtype).itemsize]


def _vmem_budget_bytes() -> int:
    """Budget for the double-buffered in+out tile footprint, per generation."""
    try:
        cap = int(pltpu.get_tpu_info().vmem_capacity_bytes)
    except Exception:
        cap = 64 * _MIB  # assume the smallest (v7x) if the query is unavailable
    # ~1/4 of physical VMEM: 16 MiB on v7x (64 MiB), 24 MiB (capped) on v5e/v6e.
    return max(8 * _MIB, min(cap // 4, 24 * _MIB))


def _pick_tc(cols: int) -> int:
    """Lane (minor-dim) tile for the input blocks."""
    if cols <= 128:
        return cols  # full row; only reachable on the rare non-flattenable path
    for cand in (1024, 512, 256, 128):
        if cols % cand == 0:
            return cand
    # cols > 128 but not a multiple of 128: 128-aligned tile + masked edge block.
    return min(512, max(128, (cols // 128) * 128))


def _pick_tr(rows: int, tc: int, itemsize: int, q: int, budget: int) -> int:
    """Row (second-minor) tile: largest sublane-aligned count whose double
    buffered in+out footprint (6*TR*TC*itemsize) fits `budget`, while keeping
    at least two row blocks so both v7x TensorCores get work."""
    if rows <= q:
        return rows  # single full-height block (equals the array dim)
    cap = max(q, budget // (6 * tc * itemsize) // q * q)
    cap = min(cap, 4096)
    cap = min(cap, max(q, _round_up((rows + 1) // 2, q)))  # >=2 parallel blocks
    return min(cap, _round_up(rows, q))


def _upsample2x_kernel(x_ref, o_ref):
    # x_ref: (TR, TC) -> o_ref: (TR, 2*TC) with o[:, 2*i + j] = x[:, i].
    # Mem-bound kernel: the lane interleave (broadcast + minor-dim fold) runs
    # on VPU/XLU slack while DMA dominates.
    o_ref[...] = jnp.repeat(x_ref[...], 2, axis=-1)


def _upsample2x_rows(x2):
    """Nearest-2x upsample along the last axis of a 2-D array (rows, cols)."""
    rows, cols = x2.shape
    itemsize = jnp.dtype(x2.dtype).itemsize
    q = _sublane_quantum(x2.dtype)
    budget = _vmem_budget_bytes()

    tc = _pick_tc(cols)
    tr = _pick_tr(rows, tc, itemsize, q, budget)
    grid = (pl.cdiv(rows, tr), pl.cdiv(cols, tc))

    footprint = 6 * tr * tc * itemsize  # double-buffered input + output tiles
    vmem_limit = min(48 * _MIB, max(16 * _MIB, footprint + footprint // 4))

    return pl.pallas_call(
        _upsample2x_kernel,
        out_shape=jax.ShapeDtypeStruct((rows, 2 * cols), x2.dtype),
        grid=grid,
        in_specs=[pl.BlockSpec((tr, tc), lambda i, j: (i, j))],
        out_specs=pl.BlockSpec((tr, 2 * tc), lambda i, j: (i, j)),
        compiler_params=pltpu.CompilerParams(
            dimension_semantics=("parallel", "parallel"),
            vmem_limit_bytes=vmem_limit,
        ),
        cost_estimate=pl.CostEstimate(
            flops=0, transcendentals=0,
            bytes_accessed=3 * rows * cols * itemsize),
    )(x2)


def upsample1d(x, layer_type: str):
    """Pallas implementation of UpSample1d.forward for a (B, C, L) array."""
    if layer_type == "none":
        return x

    B, C, L = x.shape
    R = B * C

    if L % 128 != 0 and (R * L) % 128 == 0:
        # Short / oddly-sized L: flatten row-major into a lane-dense 2-D view.
        # repeat-2x along the minor dim commutes with row-major flattening,
        # so this is bit-identical to per-row upsampling but keeps every
        # store >=128 lanes wide.
        tlw = next(t for t in (512, 256, 128) if (R * L) % t == 0)
        out2 = _upsample2x_rows(x.reshape((R * L) // tlw, tlw))
    else:
        # TODO(synk): L % 128 != 0 and (R*L) % 128 != 0 falls back to narrow
        # (masked) lane stores; correct but below the HBM roofline.
        out2 = _upsample2x_rows(x.reshape(R, L))

    return out2.reshape(B, C, 2 * L)


if __name__ == "__main__":
    k0, k1, k2 = jax.random.split(jax.random.PRNGKey(0), 3)

    # 1) Small NCL shape (flatten path: L=16 < 128, R*L = 128).
    B, C, L = 2, 4, 16
    x = jax.random.normal(k0, (B, C, L), dtype=jnp.float32)
    y = jax.block_until_ready(upsample1d(x, layer_type="nearest"))
    assert y.shape == (B, C, 2 * L), y.shape
    assert jnp.array_equal(y, jnp.repeat(x, 2, axis=-1)), "mismatch (flatten path)"

    # 2) Natural path: L multiple of 128, rows below the sublane quantum.
    x2 = jax.random.normal(k1, (2, 3, 256), dtype=jnp.float32)
    y2 = jax.block_until_ready(upsample1d(x2, layer_type="nearest"))
    assert y2.shape == (2, 3, 512), y2.shape
    assert jnp.array_equal(y2, jnp.repeat(x2, 2, axis=-1)), "mismatch (natural path)"

    # 3) Ragged row blocks (R=10 rows, TR=8 -> cdiv grid with a masked edge block).
    x3 = jax.random.normal(k2, (2, 5, 128), dtype=jnp.float32)
    y3 = jax.block_until_ready(upsample1d(x3, layer_type="nearest"))
    assert y3.shape == (2, 5, 256), y3.shape
    assert jnp.array_equal(y3, jnp.repeat(x3, 2, axis=-1)), "mismatch (ragged rows)"

    # 4) layer_type == 'none' -> identity.
    y_none = jax.block_until_ready(upsample1d(x, layer_type="none"))
    assert y_none.shape == x.shape
    assert jnp.array_equal(y_none, x)

    print("KERNEL_OK")
</pallas_src>

<mosaic_0001>
module attributes {stable_mosaic.version = 11 : i64} {
  func.func @_upsample2x_kernel(%arg0: i32, %arg1: i32, %arg2: memref<1x128xf32, #tpu.memory_space<vmem>>, %arg3: memref<1x256xf32, #tpu.memory_space<vmem>>) attributes {dimension_semantics = [#tpu.dimension_semantics<parallel>, #tpu.dimension_semantics<parallel>], iteration_bounds = array<i64: 1, 1>, scalar_prefetch = 0 : i64, scratch_operands = 0 : i64, tpu.core_type = #tpu.core_type<tc>, window_params = [{transform_indices = @transform_0, window_bounds = array<i64: 1, 128>}, {transform_indices = @transform_1, window_bounds = array<i64: 1, 256>}]} {
    %c0 = arith.constant 0 : index
    %c0_0 = arith.constant 0 : index
    %0 = vector.load %arg2[%c0, %c0_0] : memref<1x128xf32, #tpu.memory_space<vmem>>, vector<1x128xf32>
    %1 = vector.shape_cast %0 : vector<1x128xf32> to vector<1x128x1xf32>
    %2 = vector.broadcast %1 : vector<1x128x1xf32> to vector<1x128x2xf32>
    %3 = vector.shape_cast %2 : vector<1x128x2xf32> to vector<1x256xf32>
    %c0_1 = arith.constant 0 : index
    %c0_2 = arith.constant 0 : index
    %4 = vector.load %arg3[%c0_1, %c0_2] : memref<1x256xf32, #tpu.memory_space<vmem>>, vector<1x256xf32>
    tpu.vector_store %arg3[%c0_1, %c0_2], %3 {strides = array<i32>} : memref<1x256xf32, #tpu.memory_space<vmem>>, vector<1x256xf32>,
    return
  }
  func.func @transform_0(%arg0: i32, %arg1: i32) -> (i32, i32) {
    %c0_i32 = arith.constant 0 : i32
    return %arg0, %arg1 : i32, i32
  }
  func.func @transform_1(%arg0: i32, %arg1: i32) -> (i32, i32) {
    %c0_i32 = arith.constant 0 : i32
    return %arg0, %arg1 : i32, i32
  }
}

</mosaic_0001>

<bundles_post_ra>
// kernel: tpu_custom_call.1
= control target key start
LH: loop header
LB: loop body
LE: loop exit
PB: predicated region body
PF: predicated region fallthrough
CT: control target
= control target key end

     0   :  { %6 = vsyncpa [#allocation3], 0  ;;  %s2356_s0 = inlined_call_operand.hbm [shape: f32[1,128], index: 0, kind: input, shape index: {}]   ;;  %s2357_s1 = inlined_call_operand.hbm [shape: f32[1,256], index: 1, kind: output, shape index: {}]  }
   0x1   :  { %7 = vsyncpa [#allocation4], 0  ;;  %s13_s8 = sshll.u32 %s2356_s0, 4  ;;  %s1588_s9 = smov [#allocation2]   ;;  %s14_s8 = int_to_ptr.hbm [resolvable:$true] %s13_s8 }
   0x2   :  { %s15_s10 = sshll.u32 %s1588_s9, 4  ;;  %s16_s10 = int_to_ptr.vmem [resolvable:$true] %s15_s10 }
   0x3   :  { %18 = dma.hbm_to_vmem [thread:$0]  %s14_s8, 16, %s16_s10, [#allocation3]  }
   0x4   :  { %1584 = dma.done.wait [#allocation3], 16  }
   0x5   :  { %1585 = vsyncadd [#allocation3], 4294967280  ;;  %v25_v0 = vlaneseq  ;;  %v1535_v4 = vld [vmem:[#allocation2] ss:$0 sm:$0xff]  ;;  %v1589_v18 = vmov 1983009808  }
   0x6   :  { %v125_v19 = vunpack.c.l.s4 %v1589_v18  ;;  %v1590_v20 = vmov 1934713408   ;;  %s1591_s0 = smov 32   ;;  %vm122_vm0 = vcmask 1047556   ;;  %s1592_s11 = smov 2   ;;  %vm1234_vm1 = vcmask 15360  }
   0x7   :  { %v26_v1 = vshrl.u32 %v25_v0, 7  ;;  %v135_v21 = vunpack.c.l.s4 %v1590_v20  ;;  %s1593_s12 = smov 16   ;;  %s1594_s13 = smov 8   ;;  %vm1236_vm2 = vcmask 31744   ;;  %vm1238_vm3 = vcmask 48128  }
   0x8   :  { %v1669_v22 = vunpack.c.0.s8 %v125_v19  ;;  %s1595_s14 = smov 48   ;;  %s2359_s15 = smov 64   ;;  %vm1240_vm4 = vcmask 64512   ;;  %vm1242_vm5 = vcmask 80896   ;;  %vm1244_vm6 = vcmask 97280  }
   0x9   :  { %1518 = vset.pattern.permute.xlu0 %v26_v1  ;;  %v39_v2 = vadd.s32 16, %v26_v1  ;;  %v51_v3 = vadd.s32 32, %v26_v1  ;;  %v33_v5 = vadd.s32 8, %v26_v1  ;;  %v45_v6 = vadd.s32 24, %v26_v1  ;;  %s1597_s16 = smov 20   ;;  %s1598_s17 = smov 18  }
   0xa   :  { %v57_v7 = vadd.s32 40, %v26_v1  ;;  %v63_v8 = vadd.s32 48, %v26_v1  ;;  %v69_v9 = vadd.s32 56, %v26_v1  ;;  %v81_v10 = vadd.s32 72, %v26_v1  ;;  %s1599_s18 = smov 4   ;;  %s1600_s19 = smov 50  }
   0xb   :  { %1520 = vset.pattern.permute.xlu1 %v39_v2  ;;  %1522 = vset.pattern.permute.xlu2 %v51_v3  ;;  %v87_v11 = vadd.s32 80, %v26_v1  ;;  %v75_v12 = vadd.s32 64, %v26_v1  ;;  %v93_v13 = vadd.s32 88, %v26_v1  ;;  %v99_v14 = vadd.s32 96, %v26_v1  ;;  %s1601_s20 = smov 24   ;;  %s1602_s21 = smov 34  }
   0xc   :  { %v111_v15 = vadd.s32 112, %v26_v1  ;;  %v117_v16 = vadd.s32 120, %v26_v1  ;;  %v105_v17 = vadd.s32 104, %v26_v1  ;;  %v1671_v24 = vunpack.c.0.s8 %v135_v21  ;;  %s1603_s22 = smov 56   ;;  %s1604_s23 = smov 36  }
   0xd   :  { %s1605_s24 = smov 40   ;;  %s2360_s25 = smov 68   ;;  %vm1246_vm7 = vcmask 113664   ;;  %vm1248_vm8 = vcmask 130048   ;;  %vm2395_vm9 = vcmask 146432   ;;  %vm2394_vm10 = vcmask 162816  }
   0xe   :  { %s2358_s26 = smov 66   ;;  %s1608_s27 = smov 52   ;;  %vm2393_vm11 = vcmask 179200   ;;  %vm2392_vm12 = vcmask 195584   ;;  %vm2391_vm13 = vcmask 211968   ;;  %vm2390_vm14 = vcmask 228352  }
   0xf   :  { %s1609_s28 = smov 26   ;;  %s1610_s29 = smov 6   ;;  %vm2410_vm15 = vcmask 244736  }
  0x10   :  { %s1611_s30 = smov 10   ;;  %s1612_s2 = smov 38  }
  0x11   :  { %29 = vperm.xlu0 %1518, %v1535_v4   ;;  %s1613_s3 = smov 12   ;;  %s1614_s4 = smov 22  }
  0x12   :  { %s1615_s5 = smov 44   ;;  %s1616_s6 = smov 42  }
  0x13   :  { %41 = vperm.xlu1 %1520, %v1535_v4   ;;  %53 = vperm.xlu2 %1522, %v1535_v4   ;;  %s1617_s7 = smov 28   ;;  %s1618_s8 = smov 14  }
  0x14   :  { %s2365_s9 = smov 54   ;;  %s2362_s10 = smov 58  }
  0x19   :  { %1519 = vset.pattern.permute.xlu0 %v33_v5 }
  0x1b   :  { %1521 = vset.pattern.permute.xlu1 %v45_v6  ;;  %1523 = vset.pattern.permute.xlu2 %v57_v7 }
  0x21   :  { %35 = vperm.xlu0 %1519, %v1535_v4  }
  0x23   :  { %47 = vperm.xlu1 %1521, %v1535_v4   ;;  %59 = vperm.xlu2 %1523, %v1535_v4  }
  0x29   :  { %1526 = vset.pattern.permute.xlu0 %v75_v12 }
  0x2b   :  { %1524 = vset.pattern.permute.xlu1 %v63_v8  ;;  %1525 = vset.pattern.permute.xlu2 %v69_v9 }
  0x31   :  { %77 = vperm.xlu0 %1526, %v1535_v4  }
  0x33   :  { %65 = vperm.xlu1 %1524, %v1535_v4   ;;  %71 = vperm.xlu2 %1525, %v1535_v4  }
  0x39   :  { %1531 = vset.pattern.permute.xlu0 %v105_v17 }
  0x3b   :  { %1527 = vset.pattern.permute.xlu1 %v81_v10  ;;  %1528 = vset.pattern.permute.xlu2 %v87_v11 }
  0x41   :  { %107 = vperm.xlu0 %1531, %v1535_v4  }
  0x43   :  { %83 = vperm.xlu1 %1527, %v1535_v4   ;;  %89 = vperm.xlu2 %1528, %v1535_v4  }
  0x49   :  { %1534 = vset.pattern.permute.xlu0 %v117_v16 }
  0x4b   :  { %1529 = vset.pattern.permute.xlu1 %v93_v13  ;;  %1530 = vset.pattern.permute.xlu2 %v99_v14 }
  0x53   :  { %95 = vperm.xlu1 %1529, %v1535_v4   ;;  %101 = vperm.xlu2 %1530, %v1535_v4  }
  0x5b   :  { %1532 = vset.pattern.permute.xlu1 %v111_v15  ;;  %1533 = vset.pattern.permute.xlu2 %v117_v16 }
  0x63   :  { %113 = vperm.xlu1 %1532, %v1535_v4   ;;  %119 = vperm.xlu2 %1533, %v1535_v4  }
  0x6d   :  { %v1694_v38 = vpop.permute.xlu2 %53 }
  0x6e   :  { %v279_v43 = vperm.slane %v1694_v38, %v1669_v22 }
  0x70   :  { %v289_v46 = vperm.slane %v279_v43, %v1671_v24  ;;  %v284_v4 = vrot.slane %v279_v43, 4 }
  0x72   :  { %v285_v9 = vsel %vm122_vm0, 0.0, %v284_v4  ;;  %v304_v10 = vrot.slane %v289_v46, 4 }
  0x73   :  { %v1756_v12 = vperm.slane %v285_v9, %v1671_v24 }
  0x74   :  { %v305_v14 = vsel %vm122_vm0, 0.0, %v304_v10 }
  0x83   :  { %v30_v23 = vpop.permute.xlu0 %29 }
  0x84   :  { %v127_v25 = vperm.slane %v30_v23, %v1669_v22  ;;  %v121_v31 = vrot.slane %v30_v23, 4  ;;  %v1771_v23 = vpop.permute.xlu2 %59 }
  0x85   :  { %v1674_v26 = vpop.permute.xlu1 %41 }
  0x86   :  { %v203_v27 = vperm.slane %v1674_v26, %v1669_v22  ;;  %v1679_v28 = vperm.slane %v127_v25, %v1671_v24  ;;  %v123_v33 = vsel %vm122_vm0, 0.0, %v121_v31  ;;  %v132_v50 = vrot.slane %v127_v25, 4 }
  0x87   :  { %v1691_v35 = vperm.slane %v123_v33, %v1669_v22  ;;  %v198_v62 = vrot.slane %v1674_v26, 4 }
  0x88   :  { %v1682_v29 = vperm.slane %v203_v27, %v1671_v24  ;;  %v152_v30 = vrot.slane %v1679_v28, 4  ;;  %v133_v53 = vsel %vm122_vm0, 0.0, %v132_v50  ;;  %v208_v61 = vrot.slane %v203_v27, 4 }
  0x89   :  { %v1703_v42 = vperm.slane %v1691_v35, %v1671_v24  ;;  %v141_v57 = vperm.slane %v133_v53, %v1671_v24  ;;  %v199_v3 = vsel %vm122_vm0, 0.0, %v198_v62  ;;  %v142_v20 = vrot.slane %v1691_v35, 4 }
  0x8a   :  { %791 = vrot.lane.b32.xlu1 %v1682_v29, %s1591_s0  ;;  %v153_v32 = vsel %vm122_vm0, 0.0, %v152_v30  ;;  %v228_v63 = vrot.slane %v1682_v29, 4  ;;  %v209_v2 = vsel %vm122_vm0, 0.0, %v208_v61  ;;  %v207_v8 = vperm.slane %v199_v3, %v1669_v22 }
  0x8b   :  { %v217_v7 = vperm.slane %v209_v2, %v1671_v24  ;;  %v154_v18 = vrot.slane %v141_v57, 4  ;;  %v156_v25 = vrot.slane %v1703_v42, 4  ;;  %v143_v27 = vsel %vm122_vm0, 0.0, %v142_v20 }
  0x8c   :  { %v229_v5 = vsel %vm122_vm0, 0.0, %v228_v63  ;;  %v223_v11 = vperm.slane %v207_v8, %v1671_v24  ;;  %v218_v30 = vrot.slane %v207_v8, 4  ;;  %v151_v31 = vperm.slane %v143_v27, %v1671_v24 }
  0x8d   :  { %v155_v21 = vsel %vm122_vm0, 0.0, %v154_v18  ;;  %v230_v26 = vrot.slane %v217_v7, 4  ;;  %v157_v29 = vsel %vm122_vm0, 0.0, %v156_v25  ;;  %v1781_v33 = vpop.permute.xlu2 %71  ;;  %v306_v62 = vrot.slane %v1756_v12, 4 }
  0x8e   :  { %v219_v35 = vsel %vm122_vm0, 0.0, %v218_v30 }
  0x8f   :  { %v307_v3 = vsel %vm122_vm0, 0.0, %v306_v62 }
  0x92   :  { %731 = vrot.lane.b32.xlu1 %v153_v32, %s1592_s11  ;;  %v231_v32 = vsel %vm122_vm0, 0.0, %v230_v26 }
  0x93   :  { %v36_v34 = vpop.permute.xlu0 %35 }
  0x94   :  { %v165_v36 = vperm.slane %v36_v34, %v1669_v22  ;;  %v160_v48 = vrot.slane %v36_v34, 4 }
  0x95   :  { %v48_v37 = vpop.permute.xlu1 %47 }
  0x96   :  { %v175_v39 = vperm.slane %v165_v36, %v1671_v24  ;;  %v170_v40 = vrot.slane %v165_v36, 4  ;;  %v1698_v41 = vperm.slane %v48_v37, %v1669_v22  ;;  %v161_v52 = vsel %vm122_vm0, 0.0, %v160_v48 }
  0x97   :  { %v1725_v54 = vperm.slane %v161_v52, %v1669_v22  ;;  %v236_v55 = vrot.slane %v48_v37, 4  ;;  %v232_v36 = vrot.slane %v223_v11, 4 }
  0x98   :  { %759 = vrot.lane.b32.xlu2 %v175_v39, %s1593_s12  ;;  %v251_v44 = vperm.slane %v1698_v41, %v1671_v24  ;;  %v171_v45 = vsel %vm122_vm0, 0.0, %v170_v40  ;;  %v190_v47 = vrot.slane %v175_v39, 4  ;;  %v246_v13 = vrot.slane %v1698_v41, 4 }
  0x99   :  { %v1715_v49 = vperm.slane %v171_v45, %v1671_v24  ;;  %v237_v58 = vsel %vm122_vm0, 0.0, %v236_v55  ;;  %v185_v60 = vperm.slane %v1725_v54, %v1671_v24  ;;  %v180_v37 = vrot.slane %v1725_v54, 4 }
  0x9a   :  { %743 = vrot.lane.b32.xlu1 %v1703_v42, %s1594_s13  ;;  %823 = vrot.lane.b32.xlu0 %v251_v44, %s1595_s14  ;;  %v191_v51 = vsel %vm122_vm0, 0.0, %v190_v47  ;;  %v266_v56 = vrot.slane %v251_v44, 4  ;;  %v1738_v1 = vperm.slane %v237_v58, %v1669_v22  ;;  %v247_v15 = vsel %vm122_vm0, 0.0, %v246_v13 }
  0x9b   :  { %v194_v16 = vrot.slane %v185_v60, 4  ;;  %v255_v17 = vperm.slane %v247_v15, %v1671_v24  ;;  %v192_v34 = vrot.slane %v1715_v49, 4  ;;  %v227_v40 = vperm.slane %v219_v35, %v1671_v24 }
  0x9c   :  { %v267_v59 = vsel %vm122_vm0, 0.0, %v266_v56  ;;  %v1746_v6 = vperm.slane %v1738_v1, %v1671_v24  ;;  %v256_v41 = vrot.slane %v1738_v1, 4  ;;  %v233_v42 = vsel %vm122_vm0, 0.0, %v232_v36 }
  0x9d   :  { %v195_v19 = vsel %vm122_vm0, 0.0, %v194_v16  ;;  %v193_v39 = vsel %vm122_vm0, 0.0, %v192_v34  ;;  %v181_v43 = vsel %vm122_vm0, 0.0, %v180_v37  ;;  %v1795_v44 = vpop.permute.xlu2 %89  ;;  %v158_v45 = vrot.slane %v151_v31, 4 }
  0x9e   :  { %v189_v47 = vperm.slane %v181_v43, %v1671_v24  ;;  %v268_v48 = vrot.slane %v255_v17, 4  ;;  %v317_v1 = vperm.slane %v1771_v23, %v1669_v22  ;;  %v234_v10 = vrot.slane %v227_v40, 4 }
  0xa0   :  { %855 = vrot.lane.b32.xlu2 %v289_v46, %s2359_s15  ;;  %v274_v46 = vrot.slane %v1694_v38, 4  ;;  %v269_v54 = vsel %vm122_vm0, 0.0, %v268_v48  ;;  %v270_v38 = vrot.slane %v1746_v6, 4  ;;  %s2361_s15 = smov 60   ;;  %v196_v2 = vrot.slane %v189_v47, 4 }
  0xa1   :  { %v235_v13 = vsel %vm122_vm0, 0.0, %v234_v10  ;;  %v327_v15 = vperm.slane %v317_v1, %v1671_v24 }
  0xa2   :  { %767 = vrot.lane.b32.xlu1 %v1715_v49, %s1597_s16  ;;  %763 = vrot.lane.b32.xlu0 %v191_v51, %s1598_s17  ;;  %v257_v49 = vsel %vm122_vm0, 0.0, %v256_v41  ;;  %v159_v51 = vsel %vm122_vm0, 0.0, %v158_v45  ;;  %v275_v53 = vsel %vm122_vm0, 0.0, %v274_v46  ;;  %v271_v58 = vsel %vm122_vm0, 0.0, %v270_v38 }
  0xa3   :  { %v265_v52 = vperm.slane %v257_v49, %v1671_v24  ;;  %v283_v55 = vperm.slane %v275_v53, %v1669_v22  ;;  %v197_v8 = vsel %vm122_vm0, 0.0, %v196_v2 }
  0xa5   :  { %v1800_v50 = vpop.permute.xlu1 %65  ;;  %v272_v56 = vrot.slane %v265_v52, 4  ;;  %v299_v61 = vperm.slane %v283_v55, %v1671_v24  ;;  %v294_v9 = vrot.slane %v283_v55, 4 }
  0xa6   :  { %v355_v35 = vperm.slane %v1800_v50, %v1669_v22  ;;  %v350_v37 = vrot.slane %v1800_v50, 4 }
  0xa7   :  { %v308_v63 = vrot.slane %v299_v61, 4 }
  0xa8   :  { %735 = vrot.lane.b32.xlu2 %v141_v57, %s1599_s18  ;;  %v365_v41 = vperm.slane %v355_v35, %v1671_v24  ;;  %v351_v45 = vsel %vm122_vm0, 0.0, %v350_v37  ;;  %v360_v55 = vrot.slane %v355_v35, 4 }
  0xa9   :  { %v359_v50 = vperm.slane %v351_v45, %v1669_v22 }
  0xaa   :  { %827 = vrot.lane.b32.xlu1 %v267_v59, %s1600_s19  ;;  %775 = vrot.lane.b32.xlu0 %v185_v60, %s1601_s20  ;;  %v273_v60 = vsel %vm122_vm0, 0.0, %v272_v56  ;;  %v380_v49 = vrot.slane %v365_v41, 4 }
  0xac   :  { %v381_v53 = vsel %vm122_vm0, 0.0, %v380_v49 }
  0xad   :  { %v1811_v57 = vpop.permute.xlu2 %101 }
  0xb0   :  { %795 = vrot.lane.b32.xlu2 %v229_v5, %s1602_s21 }
  0xb2   :  { %839 = vrot.lane.b32.xlu1 %v1746_v6, %s1603_s22  ;;  %799 = vrot.lane.b32.xlu0 %v217_v7, %s1604_s23  ;;  %v309_v6 = vsel %vm122_vm0, 0.0, %v308_v63  ;;  %v322_v7 = vrot.slane %v317_v1, 4  ;;  %v361_v63 = vsel %vm122_vm0, 0.0, %v360_v55  ;;  %v375_v1 = vperm.slane %v359_v50, %v1671_v24 }
  0xb5   :  { %v1815_v59 = vpop.permute.xlu1 %83 }
  0xb8   :  { %807 = vrot.lane.b32.xlu2 %v223_v11, %s1605_s24  ;;  %v312_v11 = vrot.slane %v1771_v23, 4 }
  0xba   :  { %863 = vrot.lane.b32.xlu1 %v1756_v12, %s2360_s25  ;;  %859 = vrot.lane.b32.xlu0 %v305_v14, %s2358_s26  ;;  %s2366_s26 = smov 62   ;;  %s2363_s25 = smov 70   ;;  %v323_v12 = vsel %vm122_vm0, 0.0, %v322_v7  ;;  %v295_v14 = vsel %vm122_vm0, 0.0, %v294_v9 }
  0xbb   :  { %v331_v16 = vperm.slane %v323_v12, %v1671_v24  ;;  %v303_v20 = vperm.slane %v295_v14, %v1671_v24 }
  0xbd   :  { %v1826_v4 = vpop.permute.xlu2 %119  ;;  %v344_v23 = vrot.slane %v331_v16, 4  ;;  %v310_v25 = vrot.slane %v303_v20, 4 }
  0xbf   :  { %v345_v27 = vsel %vm122_vm0, 0.0, %v344_v23  ;;  %v311_v30 = vsel %vm122_vm0, 0.0, %v310_v25 }
  0xc0   :  { %831 = vrot.lane.b32.xlu2 %v255_v17, %s1608_s27  ;;  %v313_v17 = vsel %vm122_vm0, 0.0, %v312_v11  ;;  %v388_v11 = vrot.slane %v1781_v33, 4 }
  0xc2   :  { %779 = vrot.lane.b32.xlu1 %v195_v19, %s1609_s28  ;;  %739 = vrot.lane.b32.xlu0 %v155_v21, %s1610_s29  ;;  %v321_v21 = vperm.slane %v313_v17, %v1669_v22 }
  0xc4   :  { %v332_v26 = vrot.slane %v321_v21, 4  ;;  %v337_v43 = vperm.slane %v321_v21, %v1671_v24 }
  0xc5   :  { %v1828_v5 = vpop.permute.xlu1 %95 }
  0xc6   :  { %v333_v36 = vsel %vm122_vm0, 0.0, %v332_v26 }
  0xc8   :  { %747 = vrot.lane.b32.xlu2 %v157_v29, %s1611_s30 }
  0xca   :  { %803 = vrot.lane.b32.xlu1 %v231_v32, %s1612_s2  ;;  %751 = vrot.lane.b32.xlu0 %v151_v31, %s1613_s3  ;;  %v1856_v31 = vpop.permute.xlu0 %77  ;;  %v342_v32 = vrot.slane %v327_v15, 4 }
  0xcb   :  { %v431_v37 = vperm.slane %v1856_v31, %v1669_v22 }
  0xd0   :  { %771 = vrot.lane.b32.xlu2 %v193_v39, %s1614_s4  ;;  %v343_v39 = vsel %vm122_vm0, 0.0, %v342_v32 }
  0xd2   :  { %815 = vrot.lane.b32.xlu1 %v227_v40, %s1615_s5  ;;  %811 = vrot.lane.b32.xlu0 %v233_v42, %s1616_s6  ;;  %v341_v40 = vperm.slane %v333_v36, %v1671_v24  ;;  %v1873_v46 = vpop.permute.xlu0 %107 }
  0xd4   :  { %v348_v56 = vrot.slane %v341_v40, 4 }
  0xd5   :  { %v1845_v19 = vpop.permute.xlu1 %113 }
  0xd6   :  { %v349_v62 = vsel %vm122_vm0, 0.0, %v348_v56 }
  0xd8   :  { %783 = vrot.lane.b32.xlu2 %v189_v47, %s1617_s7 }
  0xda   :  { %755 = vrot.lane.b32.xlu1 %v159_v51, %s1618_s8  ;;  %835 = vrot.lane.b32.xlu0 %v269_v54, %s2365_s9  ;;  %s2368_s9 = smov 72   ;;  %v346_v51 = vrot.slane %v337_v43, 4  ;;  %v370_v54 = vrot.slane %v359_v50, 4 }
  0xe0   :  { %843 = vrot.lane.b32.xlu2 %v271_v58, %s2362_s10  ;;  %s1625_s10 = smov 30  }
  0xe2   :  { %851 = vrot.lane.b32.xlu1 %v273_v60, %s2366_s26  ;;  %847 = vrot.lane.b32.xlu0 %v265_v52, %s2361_s15  ;;  %s2364_s15 = smov 74   ;;  %s2371_s26 = smov 76  }
  0xe8   :  { %867 = vrot.lane.b32.xlu2 %v307_v3, %s2363_s25  ;;  %s1626_s25 = smov 46  }
  0xea   :  { %875 = vrot.lane.b32.xlu1 %v309_v6, %s2364_s15  ;;  %787 = vrot.lane.b32.xlu0 %v197_v8, %s1625_s10  ;;  %s2367_s15 = smov 80   ;;  %v369_v6 = vperm.slane %v361_v63, %v1671_v24  ;;  %v393_v8 = vperm.slane %v1781_v33, %v1669_v22  ;;  %v384_v33 = vrot.slane %v375_v1, 4 }
  0xec   :  { %v382_v12 = vrot.slane %v369_v6, 4  ;;  %v385_v26 = vsel %vm122_vm0, 0.0, %v384_v33  ;;  %v403_v32 = vperm.slane %v393_v8, %v1671_v24 }
  0xee   :  { %v383_v17 = vsel %vm122_vm0, 0.0, %v382_v12 }
  0xf0   :  { %819 = vrot.lane.b32.xlu2 %v235_v13, %s1626_s25  ;;  %v398_v13 = vrot.slane %v393_v8, 4 }
  0xf2   :  { %v1842_v18 = vpop.permute.xlu2 %759  ;;  %887 = vrot.lane.b32.xlu1 %v327_v15, %s2367_s15  ;;  %871 = vrot.lane.b32.xlu0 %v299_v61, %s2368_s9  ;;  %s2369_s15 = smov 86   ;;  %s2370_s9 = smov 78   ;;  %v371_v61 = vsel %vm122_vm0, 0.0, %v370_v54  ;;  %v389_v15 = vsel %vm122_vm0, 0.0, %v388_v11  ;;  %v399_v25 = vsel %vm122_vm0, 0.0, %v398_v13 }
  0xf3   :  { %v379_v2 = vperm.slane %v371_v61, %v1671_v24  ;;  %v397_v21 = vperm.slane %v389_v15, %v1669_v22 }
  0xf5   :  { %v386_v10 = vrot.slane %v379_v2, 4  ;;  %v408_v49 = vrot.slane %v397_v21, 4 }
  0xf7   :  { %v387_v14 = vsel %vm122_vm0, 0.0, %v386_v10  ;;  %v409_v56 = vsel %vm122_vm0, 0.0, %v408_v49 }
  0xf8   :  { %879 = vrot.lane.b32.xlu2 %v303_v20, %s2371_s26  ;;  %s2373_s26 = smov 84  }
  0xfa   :  { %v1852_v29 = vpop.permute.xlu2 %855  ;;  %899 = vrot.lane.b32.xlu1 %v345_v27, %s2369_s15  ;;  %883 = vrot.lane.b32.xlu0 %v311_v30, %s2370_s9  ;;  %s2374_s15 = smov 82   ;;  %s2372_s9 = smov 92   ;;  %v407_v27 = vperm.slane %v399_v25, %v1671_v24  ;;  %v413_v30 = vperm.slane %v397_v21, %v1671_v24 }
  0xfc   :  { %v1859_v34 = vpop.permute.xlu1 %791 }
 0x100   :  { %891 = vrot.lane.b32.xlu2 %v343_v39, %s2374_s15  ;;  %s2376_s15 = smov 90  }
 0x102   :  { %v736_v42 = vpop.permute.xlu2 %735  ;;  %911 = vrot.lane.b32.xlu1 %v341_v40, %s2372_s9  ;;  %895 = vrot.lane.b32.xlu0 %v331_v16, %s2373_s26  ;;  %s2375_s9 = smov 88   ;;  %s2377_s26 = smov 98   ;;  %v422_v40 = vrot.slane %v413_v30, 4 }
 0x104   :  { %v732_v47 = vpop.permute.xlu1 %731  ;;  %v423_v45 = vsel %vm122_vm0, 0.0, %v422_v40 }
 0x105   :  { %v1235_v48 = vsel %vm1234_vm1, %v1679_v28, %v732_v47  ;;  %v347_v28 = vsel %vm122_vm0, 0.0, %v346_v51 }
 0x106   :  { %v1879_v52 = vsel %vm1236_vm2, %v1235_v48, %v736_v42  ;;  %v426_v42 = vrot.slane %v1856_v31, 4  ;;  %v420_v31 = vrot.slane %v407_v27, 4 }
 0x108   :  { %903 = vrot.lane.b32.xlu2 %v337_v43, %s2375_s9  ;;  %s2378_s9 = smov 94   ;;  %v1940_v43 = vperm.slane %v431_v37, %v1671_v24  ;;  %v427_v50 = vsel %vm122_vm0, 0.0, %v426_v42  ;;  %v421_v55 = vsel %vm122_vm0, 0.0, %v420_v31 }
 0x10a   :  { %v1883_v38 = vpop.permute.xlu2 %795  ;;  %923 = vrot.lane.b32.xlu1 %v381_v53, %s2377_s26  ;;  %907 = vrot.lane.b32.xlu0 %v347_v28, %s2376_s15  ;;  %s2380_s15 = smov 104   ;;  %s2379_s26 = smov 96   ;;  %v456_v54 = vrot.slane %v1940_v43, 4  ;;  %v435_v28 = vperm.slane %v427_v50, %v1669_v22 }
 0x10c   :  { %v1888_v58 = vpop.permute.xlu1 %743  ;;  %v1890_v60 = vpop.permute.xlu0 %823  ;;  %v457_v61 = vsel %vm122_vm0, 0.0, %v456_v54  ;;  %v451_v15 = vperm.slane %v435_v28, %v1671_v24 }
 0x10e   :  { %v460_v49 = vrot.slane %v451_v15, 4 }
 0x110   :  { %915 = vrot.lane.b32.xlu2 %v349_v62, %s2378_s9  ;;  %s2381_s9 = smov 100   ;;  %v446_v62 = vrot.slane %v435_v28, 4  ;;  %v461_v28 = vsel %vm122_vm0, 0.0, %v460_v49 }
 0x112   :  { %v1898_v3 = vpop.permute.xlu2 %807  ;;  %935 = vrot.lane.b32.xlu1 %v375_v1, %s2380_s15  ;;  %919 = vrot.lane.b32.xlu0 %v365_v41, %s2379_s26  ;;  %s2383_s26 = smov 110   ;;  %s2382_s15 = smov 102   ;;  %v418_v41 = vrot.slane %v403_v32, 4  ;;  %v417_v1 = vperm.slane %v409_v56, %v1671_v24  ;;  %v447_v12 = vsel %vm122_vm0, 0.0, %v446_v62 }
 0x113   :  { %v455_v33 = vperm.slane %v447_v12, %v1671_v24 }
 0x114   :  { %v1903_v7 = vpop.permute.xlu1 %767  ;;  %v1907_v9 = vpop.permute.xlu0 %763  ;;  %v419_v48 = vsel %vm122_vm0, 0.0, %v418_v41  ;;  %v424_v11 = vrot.slane %v417_v1, 4 }
 0x118   :  { %927 = vrot.lane.b32.xlu2 %v369_v6, %s2381_s9  ;;  %s2384_s9 = smov 106  }
 0x11a   :  { %v1913_v16 = vpop.permute.xlu2 %831  ;;  %947 = vrot.lane.b32.xlu1 %v387_v14, %s2383_s26  ;;  %931 = vrot.lane.b32.xlu0 %v383_v17, %s2382_s15  ;;  %s2386_s15 = smov 116   ;;  %s2385_s26 = smov 108  }
 0x11c   :  { %v1918_v20 = vpop.permute.xlu1 %827  ;;  %v1921_v23 = vpop.permute.xlu0 %775 }
 0x120   :  { %939 = vrot.lane.b32.xlu2 %v385_v26, %s2384_s9  ;;  %s1647_s9 = smov 112   ;;  %v469_v26 = vperm.slane %v1815_v59, %v1669_v22 }
 0x122   :  { %v748_v35 = vpop.permute.xlu2 %747  ;;  %959 = vrot.lane.b32.xlu1 %v407_v27, %s2386_s15  ;;  %943 = vrot.lane.b32.xlu0 %v379_v2, %s2385_s26  ;;  %s2387_s26 = smov 122   ;;  %s2388_s15 = smov 114   ;;  %v436_v2 = vrot.slane %v431_v37, 4  ;;  %v474_v40 = vrot.slane %v469_v26, 4 }
 0x124   :  { %v1931_v36 = vpop.permute.xlu1 %839  ;;  %v1935_v39 = vpop.permute.xlu0 %799  ;;  %v437_v14 = vsel %vm122_vm0, 0.0, %v436_v2  ;;  %v475_v54 = vsel %vm122_vm0, 0.0, %v474_v40 }
 0x125   :  { %v445_v25 = vperm.slane %v437_v14, %v1671_v24 }
 0x127   :  { %v458_v37 = vrot.slane %v445_v25, 4 }
 0x128   :  { %951 = vrot.lane.b32.xlu2 %v403_v32, %s1647_s9  ;;  %v464_v32 = vrot.slane %v1815_v59, 4 }
 0x12a   :  { %v1943_v47 = vpop.permute.xlu2 %771  ;;  %971 = vrot.lane.b32.xlu1 %v423_v45, %s2387_s26  ;;  %955 = vrot.lane.b32.xlu0 %v419_v48, %s2388_s15  ;;  %s1650_s26 = smov 118   ;;  %s2389_s15 = smov 120   ;;  %v465_v42 = vsel %vm122_vm0, 0.0, %v464_v32  ;;  %v459_v48 = vsel %vm122_vm0, 0.0, %v458_v37 }
 0x12b   :  { %v473_v50 = vperm.slane %v465_v42, %v1669_v22 }
 0x12c   :  { %v1949_v51 = vpop.permute.xlu1 %863  ;;  %v1951_v53 = vpop.permute.xlu0 %859 }
 0x12d   :  { %v489_v56 = vperm.slane %v473_v50, %v1671_v24 }
 0x130   :  { %963 = vrot.lane.b32.xlu2 %v421_v55, %s1650_s26  ;;  %v483_v55 = vperm.slane %v475_v54, %v1671_v24 }
 0x132   :  { %v1959_v63 = vpop.permute.xlu2 %783  ;;  %983 = vrot.lane.b32.xlu1 %v457_v61, %s1592_s11  ;;  %967 = vrot.lane.b32.xlu0 %v413_v30, %s2389_s15  ;;  %s1652_s11 = smov 124   ;;  %s1653_s15 = smov 126   ;;  %v462_v30 = vrot.slane %v455_v33, 4  ;;  %v479_v61 = vperm.slane %v469_v26, %v1671_v24  ;;  %v496_v26 = vrot.slane %v483_v55, 4 }
 0x134   :  { %v1964_v6 = vpop.permute.xlu1 %779  ;;  %v740_v8 = vpop.permute.xlu0 %739  ;;  %v463_v41 = vsel %vm122_vm0, 0.0, %v462_v30 }
 0x135   :  { %v1239_v10 = vsel %vm1238_vm3, %v1879_v52, %v740_v8  ;;  %v425_v52 = vsel %vm122_vm0, 0.0, %v424_v11  ;;  %v507_v11 = vperm.slane %v1795_v44, %v1669_v22 }
 0x136   :  { %v1241_v13 = vsel %vm1240_vm4, %v1239_v10, %v1888_v58  ;;  %v498_v10 = vrot.slane %v489_v56, 4 }
 0x137   :  { %v1243_v17 = vsel %vm1242_vm5, %v1241_v13, %v748_v35  ;;  %v494_v13 = vrot.slane %v479_v61, 4 }
 0x138   :  { %975 = vrot.lane.b32.xlu2 %v417_v1, %s1652_s11 }
 0x13a   :  { %v1976_v21 = vpop.permute.xlu2 %843  ;;  %995 = vrot.lane.b32.xlu1 %v451_v15, %s1594_s13  ;;  %979 = vrot.lane.b32.xlu0 %v425_v52, %s1653_s15  ;;  %v512_v52 = vrot.slane %v507_v11, 4  ;;  %s2439_s13 = smov 58  }
 0x13c   :  { %v1982_v58 = vpop.permute.xlu1 %803  ;;  %v752_v27 = vpop.permute.xlu0 %751  ;;  %v513_v37 = vsel %vm122_vm0, 0.0, %v512_v52  ;;  %v540_v52 = vrot.slane %v1828_v5, 4 }
 0x13d   :  { %v1245_v35 = vsel %vm1244_vm6, %v1243_v17, %v752_v27  ;;  %v499_v17 = vsel %vm122_vm0, 0.0, %v498_v10 }
 0x140   :  { %987 = vrot.lane.b32.xlu2 %v445_v25, %s1599_s18  ;;  %v495_v25 = vsel %vm122_vm0, 0.0, %v494_v13  ;;  %s2443_s18 = smov 74  }
 0x142   :  { %v1991_v45 = vpop.permute.xlu2 %867  ;;  %1007 = vrot.lane.b32.xlu1 %v463_v41, %s1618_s8  ;;  %991 = vrot.lane.b32.xlu0 %v459_v48, %s1610_s29  ;;  %v517_v41 = vperm.slane %v507_v11, %v1671_v24  ;;  %s2453_s29 = smov 84   ;;  %s2461_s8 = smov 110  }
 0x144   :  { %v1996_v59 = vpop.permute.xlu1 %815  ;;  %v1999_v31 = vpop.permute.xlu0 %811  ;;  %v532_v13 = vrot.slane %v517_v41, 4 }
 0x148   :  { %999 = vrot.lane.b32.xlu2 %v461_v28, %s1611_s30  ;;  %s2454_s30 = smov 88  }
 0x14a   :  { %v2007_v62 = vpop.permute.xlu2 %819  ;;  %1019 = vrot.lane.b32.xlu1 %v483_v55, %s1597_s16  ;;  %1003 = vrot.lane.b32.xlu0 %v455_v33, %s1613_s3  ;;  %s2441_s16 = smov 60   ;;  %s2456_s3 = smov 90  }
 0x14c   :  { %v756_v1 = vpop.permute.xlu1 %755  ;;  %v2012_v8 = vpop.permute.xlu0 %835 }
 0x14d   :  { %v1247_v2 = vsel %vm1246_vm7, %v1245_v35, %v756_v1  ;;  %v502_v35 = vrot.slane %v1795_v44, 4 }
 0x14e   :  { %v1249_v12 = vsel %vm1248_vm8, %v1247_v2, %v1842_v18 }
 0x14f   :  { %v1251_v14 = vsel %vm2395_vm9, %v1249_v12, %v1907_v9  ;;  %v503_v42 = vsel %vm122_vm0, 0.0, %v502_v35  ;;  %vm2401_vm9 = vcmask 343040  }
 0x150   :  { %v1253_v15 = vsel %vm2394_vm10, %v1251_v14, %v1903_v7  ;;  %1011 = vrot.lane.b32.xlu2 %v479_v61, %s1593_s12  ;;  %v484_v7 = vrot.slane %v473_v50, 4  ;;  %v511_v49 = vperm.slane %v503_v42, %v1669_v22  ;;  %vm2400_vm10 = vcmask 326656   ;;  %s2438_s12 = smov 54  }
 0x151   :  { %v1255_v33 = vsel %vm2393_vm11, %v1253_v15, %v1943_v47  ;;  %vm2399_vm11 = vcmask 310272   ;;  %v2084_v15 = vperm.slane %v1828_v5, %v1669_v22 }
 0x152   :  { %v2026_v18 = vpop.permute.xlu2 %879  ;;  %1031 = vrot.lane.b32.xlu1 %v499_v17, %s1609_s28  ;;  %v1257_v9 = vsel %vm2392_vm12, %v1255_v33, %v1921_v23  ;;  %1015 = vrot.lane.b32.xlu0 %v495_v25, %s1598_s17  ;;  %v497_v23 = vsel %vm122_vm0, 0.0, %v496_v26  ;;  %v485_v40 = vsel %vm122_vm0, 0.0, %v484_v7  ;;  %vm2398_vm12 = vcmask 293888   ;;  %s2442_s17 = smov 64   ;;  %s2452_s28 = smov 92  }
 0x153   :  { %v1259_v27 = vsel %vm2391_vm13, %v1257_v9, %v1964_v6  ;;  %v2048_v6 = vperm.slane %v513_v37, %v1671_v24  ;;  %v493_v44 = vperm.slane %v485_v40, %v1671_v24  ;;  %vm2396_vm13 = vcmask 277504  }
 0x154   :  { %v2035_v30 = vpop.permute.xlu1 %851  ;;  %v1261_v47 = vsel %vm2390_vm14, %v1259_v27, %v1959_v63  ;;  %v2039_v32 = vpop.permute.xlu0 %847  ;;  %vm2397_vm14 = vcmask 261120   ;;  %v522_v1 = vrot.slane %v511_v49, 4  ;;  %v533_v25 = vsel %vm122_vm0, 0.0, %v532_v13 }
 0x155   :  { %v534_v54 = vrot.slane %v2048_v6, 4  ;;  %v500_v55 = vrot.slane %v493_v44, 4  ;;  %v541_v26 = vsel %vm122_vm0, 0.0, %v540_v52 }
 0x156   :  { %v523_v33 = vsel %vm122_vm0, 0.0, %v522_v1 }
 0x157   :  { %v535_v2 = vsel %vm122_vm0, 0.0, %v534_v54  ;;  %v501_v12 = vsel %vm122_vm0, 0.0, %v500_v55 }
 0x158   :  { %1023 = vrot.lane.b32.xlu2 %v497_v23, %s1614_s4  ;;  %v549_v23 = vperm.slane %v541_v26, %v1669_v22  ;;  %s2457_s4 = smov 94  }
 0x15a   :  { %v2051_v63 = vpop.permute.xlu2 %891  ;;  %1043 = vrot.lane.b32.xlu1 %v517_v41, %s1591_s0  ;;  %1027 = vrot.lane.b32.xlu0 %v489_v56, %s1601_s20  ;;  %v560_v42 = vrot.slane %v549_v23, 4  ;;  %s2437_s0 = smov 62   ;;  %s2445_s20 = smov 70  }
 0x15c   :  { %v2056_v48 = vpop.permute.xlu1 %875  ;;  %v788_v50 = vpop.permute.xlu0 %787 }
 0x15d   :  { %v1263_v28 = vsel %vm2410_vm15, %v1261_v47, %v788_v50  ;;  %vm2417_vm15 = vcmask 588800  }
 0x15e   :  { %v1265_v61 = vsel %vm2397_vm14, %v1263_v28, %v1859_v34  ;;  %vm2403_vm14 = vcmask 375808  }
 0x15f   :  { %v1267_v56 = vsel %vm2396_vm13, %v1265_v61, %v1883_v38  ;;  %vm2402_vm13 = vcmask 359424   ;;  %v561_v61 = vsel %vm122_vm0, 0.0, %v560_v42 }
 0x160   :  { %1035 = vrot.lane.b32.xlu2 %v493_v44, %s1617_s7  ;;  %v1269_v10 = vsel %vm2398_vm12, %v1267_v56, %v1935_v39  ;;  %vm2404_vm12 = vcmask 392192   ;;  %s2460_s7 = smov 100  }
 0x161   :  { %v1271_v34 = vsel %vm2399_vm11, %v1269_v10, %v1982_v58  ;;  %vm2405_vm11 = vcmask 408576  }
 0x162   :  { %v2069_v11 = vpop.permute.xlu2 %903  ;;  %1055 = vrot.lane.b32.xlu1 %v535_v2, %s1612_s2  ;;  %1039 = vrot.lane.b32.xlu0 %v501_v12, %s1625_s10  ;;  %v1273_v38 = vsel %vm2400_vm10, %v1271_v34, %v1898_v3  ;;  %vm2407_vm10 = vcmask 424960   ;;  %v569_v12 = vperm.slane %v561_v61, %v1671_v24  ;;  %s2455_s2 = smov 98   ;;  %s2462_s10 = smov 102  }
 0x163   :  { %v1275_v39 = vsel %vm2401_vm9, %v1273_v38, %v1999_v31  ;;  %vm2406_vm9 = vcmask 441344  }
 0x164   :  { %v2078_v14 = vpop.permute.xlu1 %887  ;;  %v1277_v58 = vsel %vm2402_vm13, %v1275_v39, %v1996_v59  ;;  %v872_v17 = vpop.permute.xlu0 %871  ;;  %vm2408_vm13 = vcmask 457728   ;;  %v531_v59 = vperm.slane %v523_v33, %v1671_v24  ;;  %v583_v39 = vperm.slane %v1811_v57, %v1669_v22 }
 0x165   :  { %v1279_v3 = vsel %vm2403_vm14, %v1277_v58, %v2007_v62  ;;  %v2101_v62 = vperm.slane %v2084_v15, %v1671_v24  ;;  %vm2409_vm14 = vcmask 474112   ;;  %v576_v58 = vrot.slane %v569_v12, 4 }
 0x166   :  { %v1281_v31 = vsel %vm2404_vm12, %v1279_v3, %v1890_v60  ;;  %vm2411_vm12 = vcmask 490496  }
 0x167   :  { %v1283_v9 = vsel %vm2405_vm11, %v1281_v31, %v1918_v20  ;;  %v527_v20 = vperm.slane %v511_v49, %v1671_v24  ;;  %vm2412_vm11 = vcmask 506880   ;;  %v570_v37 = vrot.slane %v2101_v62, 4 }
 0x168   :  { %1047 = vrot.lane.b32.xlu2 %v533_v25, %s1602_s21  ;;  %v1285_v5 = vsel %vm2407_vm10, %v1283_v9, %v1913_v16  ;;  %vm2413_vm10 = vcmask 539648   ;;  %v588_v31 = vrot.slane %v583_v39, 4  ;;  %v577_v25 = vsel %vm122_vm0, 0.0, %v576_v58  ;;  %s2446_s21 = smov 80  }
 0x169   :  { %v1287_v60 = vsel %vm2406_vm9, %v1285_v5, %v2012_v8  ;;  %vm2416_vm9 = vcmask 523264   ;;  %v536_v40 = vrot.slane %v527_v20, 4 }
 0x16a   :  { %v2107_v7 = vpop.permute.xlu2 %915  ;;  %1067 = vrot.lane.b32.xlu1 %v531_v59, %s1615_s5  ;;  %v1289_v27 = vsel %vm2408_vm13, %v1287_v60, %v1931_v36  ;;  %1051 = vrot.lane.b32.xlu0 %v2048_v6, %s1604_s23  ;;  %vm2414_vm13 = vcmask 556032   ;;  %v571_v6 = vsel %vm122_vm0, 0.0, %v570_v37  ;;  %v593_v37 = vperm.slane %v583_v39, %v1671_v24  ;;  %s2448_s23 = smov 76   ;;  %s2458_s5 = smov 104  }
 0x16b   :  { %v1291_v16 = vsel %vm2409_vm14, %v1289_v27, %v1976_v21  ;;  %vm2415_vm14 = vcmask 572416  }
 0x16c   :  { %v900_v8 = vpop.permute.xlu1 %899  ;;  %v1293_v47 = vsel %vm2411_vm12, %v1291_v16, %v2039_v32  ;;  %v884_v35 = vpop.permute.xlu0 %883  ;;  %vm1306_vm12 = vcmask 605184  }
 0x16d   :  { %v1295_v36 = vsel %vm2412_vm11, %v1293_v47, %v2035_v30  ;;  %vm2418_vm11 = vcmask 621568  }
 0x16e   :  { %v1297_v41 = vsel %vm2416_vm9, %v1295_v36, %v1852_v29  ;;  %v537_v29 = vsel %vm122_vm0, 0.0, %v536_v40  ;;  %vm1316_vm9 = vcmask 687104  }
 0x16f   :  { %v1299_v21 = vsel %vm2413_vm10, %v1297_v41, %v1951_v53  ;;  %v550_v53 = vrot.slane %v2084_v15, 4  ;;  %vm1310_vm10 = vcmask 637952  }
 0x170   :  { %1059 = vrot.lane.b32.xlu2 %v527_v20, %s1605_s24  ;;  %v1301_v32 = vsel %vm2414_vm13, %v1299_v21, %v1949_v51  ;;  %v538_v51 = vrot.slane %v531_v59, 4  ;;  %vm2420_vm13 = vcmask 654336   ;;  %v621_v21 = vperm.slane %v1873_v46, %v1669_v22  ;;  %s2449_s24 = smov 86  }
 0x171   :  { %v1303_v30 = vsel %vm2415_vm14, %v1301_v32, %v1991_v45  ;;  %vm2419_vm14 = vcmask 670720  }
 0x172   :  { %v2134_v44 = vpop.permute.xlu2 %927  ;;  %1079 = vrot.lane.b32.xlu1 %v571_v6, %s1600_s19  ;;  %v1305_v49 = vsel %vm2417_vm15, %v1303_v30, %v872_v17  ;;  %1063 = vrot.lane.b32.xlu0 %v537_v29, %s1616_s6  ;;  %vm2421_vm15 = vcmask 703488   ;;  %v539_v1 = vsel %vm122_vm0, 0.0, %v538_v51  ;;  %v578_v17 = vrot.slane %v1811_v57, 4  ;;  %s2444_s19 = smov 66   ;;  %s2459_s6 = smov 96  }
 0x173   :  { %v1307_v50 = vsel %vm1306_vm12, %v1305_v49, %v2056_v48  ;;  %v551_v48 = vsel %vm122_vm0, 0.0, %v550_v53  ;;  %v608_v6 = vrot.slane %v593_v37, 4  ;;  %v626_v29 = vrot.slane %v621_v21, 4 }
 0x174   :  { %v912_v45 = vpop.permute.xlu1 %911  ;;  %v1309_v54 = vsel %vm2418_vm11, %v1307_v50, %v2026_v18  ;;  %v896_v28 = vpop.permute.xlu0 %895  ;;  %v565_v18 = vperm.slane %v549_v23, %v1671_v24  ;;  %vm2427_vm11 = vcmask 719872   ;;  %v559_v13 = vperm.slane %v551_v48, %v1671_v24 }
 0x175   :  { %v1311_v55 = vsel %vm1310_vm10, %v1309_v54, %v884_v35  ;;  %v579_v9 = vsel %vm122_vm0, 0.0, %v578_v17  ;;  %v609_v49 = vsel %vm122_vm0, 0.0, %v608_v6 }
 0x176   :  { %v1313_v56 = vsel %vm2420_vm13, %v1311_v55, %v2078_v14  ;;  %vm2423_vm13 = vcmask 752640   ;;  %v572_v3 = vrot.slane %v559_v13, 4  ;;  %v574_v57 = vrot.slane %v565_v18, 4 }
 0x177   :  { %v1315_v2 = vsel %vm2419_vm14, %v1313_v56, %v2051_v63  ;;  %vm2422_vm14 = vcmask 736256   ;;  %v587_v60 = vperm.slane %v579_v9, %v1669_v22  ;;  %v627_v55 = vsel %vm122_vm0, 0.0, %v626_v29 }
 0x178   :  { %1071 = vrot.lane.b32.xlu2 %v539_v1, %s1626_s25  ;;  %v1317_v10 = vsel %vm1316_vm9, %v1315_v2, %v896_v28  ;;  %v575_v16 = vsel %vm122_vm0, 0.0, %v574_v57  ;;  %v616_v28 = vrot.slane %v1873_v46, 4  ;;  %v631_v2 = vperm.slane %v621_v21, %v1671_v24  ;;  %s2450_s25 = smov 78  }
 0x179   :  { %v1319_v34 = vsel %vm2421_vm15, %v1317_v10, %v900_v8  ;;  %vm2424_vm15 = vcmask 769024   ;;  %v603_v35 = vperm.slane %v587_v60, %v1671_v24  ;;  %v598_v51 = vrot.slane %v587_v60, 4 }
 0x17a   :  { %v940_v38 = vpop.permute.xlu2 %939  ;;  %1091 = vrot.lane.b32.xlu1 %v565_v18, %s1603_s22  ;;  %1075 = vrot.lane.b32.xlu0 %v2101_v62, %s1595_s14  ;;  %v1321_v63 = vsel %vm2427_vm11, %v1319_v34, %v2069_v11  ;;  %v573_v62 = vsel %vm122_vm0, 0.0, %v572_v3  ;;  %s2440_s14 = smov 68   ;;  %vm2433_vm11 = vcmask 867328   ;;  %v635_v10 = vperm.slane %v627_v55, %v1671_v24  ;;  %s2447_s22 = smov 72  }
 0x17b   :  { %v612_v41 = vrot.slane %v603_v35, 4  ;;  %v599_v48 = vsel %vm122_vm0, 0.0, %v598_v51  ;;  %v617_v46 = vsel %vm122_vm0, 0.0, %v616_v28  ;;  %v659_v9 = vperm.slane %v1845_v19, %v1669_v22 }
 0x17c   :  { %v924_v14 = vpop.permute.xlu1 %923  ;;  %v908_v15 = vpop.permute.xlu0 %907  ;;  %v607_v34 = vperm.slane %v599_v48, %v1671_v24 }
 0x17d   :  { %v1323_v33 = vsel %vm2422_vm14, %v1321_v63, %v908_v15  ;;  %vm2425_vm14 = vcmask 785408  }
 0x17e   :  { %v1325_v52 = vsel %vm2423_vm13, %v1323_v33, %v912_v45  ;;  %vm2426_vm13 = vcmask 801792   ;;  %v614_v15 = vrot.slane %v607_v34, 4 }
 0x17f   :  { %v1327_v11 = vsel %vm2424_vm15, %v1325_v52, %v2107_v7  ;;  %v589_v7 = vsel %vm122_vm0, 0.0, %v588_v31  ;;  %vm2428_vm15 = vcmask 818176   ;;  %v646_v31 = vrot.slane %v631_v2, 4 }
 0x180   :  { %1083 = vrot.lane.b32.xlu2 %v559_v13, %s1608_s27  ;;  %v597_v8 = vperm.slane %v589_v7, %v1671_v24  ;;  %v625_v13 = vperm.slane %v617_v46, %v1669_v22  ;;  %s2451_s27 = smov 82   ;;  %v692_v46 = vrot.slane %v1826_v4, 4 }
 0x182   :  { %v952_v59 = vpop.permute.xlu2 %951  ;;  %1103 = vrot.lane.b32.xlu1 %v577_v25, %s2437_s0  ;;  %1087 = vrot.lane.b32.xlu0 %v573_v62, %s2438_s12  ;;  %v610_v50 = vrot.slane %v597_v8, 4  ;;  %v636_v33 = vrot.slane %v625_v13, 4  ;;  %s2465_s0 = smov 106   ;;  %s2467_s12 = smov 116  }
 0x184   :  { %v936_v5 = vpop.permute.xlu1 %935  ;;  %v920_v20 = vpop.permute.xlu0 %919  ;;  %v611_v1 = vsel %vm122_vm0, 0.0, %v610_v50  ;;  %v637_v57 = vsel %vm122_vm0, 0.0, %v636_v33 }
 0x185   :  { %v1329_v26 = vsel %vm2425_vm14, %v1327_v11, %v920_v20  ;;  %vm2429_vm14 = vcmask 834560   ;;  %v615_v11 = vsel %vm122_vm0, 0.0, %v614_v15  ;;  %v654_v20 = vrot.slane %v1845_v19, 4 }
 0x186   :  { %v1331_v27 = vsel %vm2426_vm13, %v1329_v26, %v924_v14  ;;  %vm2430_vm13 = vcmask 850944   ;;  %v648_v14 = vrot.slane %v635_v10, 4  ;;  %v647_v26 = vsel %vm122_vm0, 0.0, %v646_v31 }
 0x187   :  { %v1333_v47 = vsel %vm2428_vm15, %v1331_v27, %v2134_v44  ;;  %v613_v44 = vsel %vm122_vm0, 0.0, %v612_v41  ;;  %vm2432_vm15 = vcmask 883712   ;;  %v645_v27 = vperm.slane %v637_v57, %v1671_v24 }
 0x188   :  { %1095 = vrot.lane.b32.xlu2 %v575_v16, %s2439_s13  ;;  %v649_v3 = vsel %vm122_vm0, 0.0, %v648_v14  ;;  %v669_v16 = vperm.slane %v659_v9, %v1671_v24  ;;  %s2468_s13 = smov 108  }
 0x18a   :  { %v964_v23 = vpop.permute.xlu2 %963  ;;  %1115 = vrot.lane.b32.xlu1 %v597_v8, %s2440_s14  ;;  %1099 = vrot.lane.b32.xlu0 %v569_v12, %s2441_s16  ;;  %s2472_s14 = smov 122   ;;  %s2473_s16 = smov 114  }
 0x18c   :  { %v948_v36 = vpop.permute.xlu1 %947  ;;  %v932_v40 = vpop.permute.xlu0 %931 }
 0x18d   :  { %v1335_v32 = vsel %vm2429_vm14, %v1333_v47, %v932_v40  ;;  %vm2431_vm14 = vcmask 900096   ;;  %v641_v47 = vperm.slane %v625_v13, %v1671_v24 }
 0x18e   :  { %v1337_v42 = vsel %vm2430_vm13, %v1335_v32, %v936_v5  ;;  %vm2434_vm13 = vcmask 916480  }
 0x18f   :  { %v1339_v30 = vsel %vm2433_vm11, %v1337_v42, %v940_v38  ;;  %vm2436_vm11 = vcmask 965632   ;;  %v650_v41 = vrot.slane %v641_v47, 4 }
 0x190   :  { %1107 = vrot.lane.b32.xlu2 %v593_v37, %s2442_s17 }
 0x191   :  { %v651_v42 = vsel %vm122_vm0, 0.0, %v650_v41 }
 0x192   :  { %v976_v53 = vpop.permute.xlu2 %975  ;;  %1127 = vrot.lane.b32.xlu1 %v613_v44, %s2443_s18  ;;  %1111 = vrot.lane.b32.xlu0 %v609_v49, %s2444_s19  ;;  %v652_v44 = vrot.slane %v645_v27, 4  ;;  %s1441_s18 = sshll.u32 %s2357_s1, 4  ;;  %s1442_s18 = int_to_ptr.hbm [resolvable:$true] %s1441_s18 }
 0x194   :  { %v960_v45 = vpop.permute.xlu1 %959  ;;  %v944_v54 = vpop.permute.xlu0 %943 }
 0x195   :  { %v1341_v61 = vsel %vm2432_vm15, %v1339_v30, %v944_v54  ;;  %vm1348_vm15 = vcmask 949248   ;;  %v664_v30 = vrot.slane %v659_v9, 4 }
 0x196   :  { %v1343_v56 = vsel %vm2431_vm14, %v1341_v61, %v948_v36  ;;  %vm2435_vm14 = vcmask 932864  }
 0x197   :  { %v1345_v18 = vsel %vm2434_vm13, %v1343_v56, %v952_v59  ;;  %vm1352_vm13 = vcmask 982016   ;;  %v665_v54 = vsel %vm122_vm0, 0.0, %v664_v30 }
 0x198   :  { %1119 = vrot.lane.b32.xlu2 %v611_v1, %s2445_s20  ;;  %v673_v1 = vperm.slane %v665_v54, %v1671_v24 }
 0x19a   :  { %v988_v12 = vpop.permute.xlu2 %987  ;;  %1139 = vrot.lane.b32.xlu1 %v631_v2, %s2446_s21  ;;  %1123 = vrot.lane.b32.xlu0 %v603_v35, %s2447_s22  ;;  %v655_v35 = vsel %vm122_vm0, 0.0, %v654_v20  ;;  %v697_v2 = vperm.slane %v1826_v4, %v1669_v22 }
 0x19b   :  { %v663_v36 = vperm.slane %v655_v35, %v1669_v22 }
 0x19c   :  { %v972_v38 = vpop.permute.xlu1 %971  ;;  %v956_v63 = vpop.permute.xlu0 %955  ;;  %v707_v57 = vperm.slane %v697_v2, %v1671_v24 }
 0x19d   :  { %v1347_v39 = vsel %vm2435_vm14, %v1345_v18, %v956_v63  ;;  %vm1354_vm14 = vcmask 998400   ;;  %v674_v32 = vrot.slane %v663_v36, 4  ;;  %v679_v28 = vperm.slane %v663_v36, %v1671_v24 }
 0x19e   :  { %v1349_v58 = vsel %vm1348_vm15, %v1347_v39, %v960_v45  ;;  %v653_v45 = vsel %vm122_vm0, 0.0, %v652_v44  ;;  %v702_v63 = vrot.slane %v697_v2, 4  ;;  %v693_v39 = vsel %vm122_vm0, 0.0, %v692_v46 }
 0x19f   :  { %v1351_v17 = vsel %vm2436_vm11, %v1349_v58, %v964_v23  ;;  %vm1356_vm11 = vcmask 1014784   ;;  %v684_v23 = vrot.slane %v669_v16, 4  ;;  %v675_v51 = vsel %vm122_vm0, 0.0, %v674_v32 }
 0x1a0   :  { %1131 = vrot.lane.b32.xlu2 %v607_v34, %s2448_s23  ;;  %v683_v61 = vperm.slane %v675_v51, %v1671_v24  ;;  %v686_v34 = vrot.slane %v673_v1, 4  ;;  %v688_v4 = vrot.slane %v679_v28, 4  ;;  %v701_v33 = vperm.slane %v693_v39, %v1669_v22 }
 0x1a1   :  { %v685_v21 = vsel %vm122_vm0, 0.0, %v684_v23 }
 0x1a2   :  { %v1000_v52 = vpop.permute.xlu2 %999  ;;  %1151 = vrot.lane.b32.xlu1 %v649_v3, %s2449_s24  ;;  %1135 = vrot.lane.b32.xlu0 %v615_v11, %s2450_s25  ;;  %v687_v58 = vsel %vm122_vm0, 0.0, %v686_v34  ;;  %v712_v35 = vrot.slane %v701_v33, 4 }
 0x1a4   :  { %v984_v25 = vpop.permute.xlu1 %983  ;;  %v968_v62 = vpop.permute.xlu0 %967  ;;  %v713_v32 = vsel %vm122_vm0, 0.0, %v712_v35 }
 0x1a5   :  { %v1360_v59 = vsel %vm1234_vm1, %v1940_v43, %v984_v25  ;;  %v1353_v5 = vsel %vm1352_vm13, %v1351_v17, %v968_v62  ;;  %vm1358_vm1 = vcmask 1031168   ;;  %v689_v25 = vsel %vm122_vm0, 0.0, %v688_v4 }
 0x1a6   :  { %v1361_v60 = vsel %vm1236_vm2, %v1360_v59, %v988_v12  ;;  %v1355_v7 = vsel %vm1354_vm14, %v1353_v5, %v972_v38  ;;  %vm2463_vm2 = vcmask 146432   ;;  %v717_v62 = vperm.slane %v701_v33, %v1671_v24 }
 0x1a7   :  { %v1357_v43 = vsel %vm1356_vm11, %v1355_v7, %v976_v53 }
 0x1a8   :  { %1143 = vrot.lane.b32.xlu2 %v647_v26, %s2451_s27  ;;  %v726_v20 = vrot.slane %v717_v62, 4  ;;  %v722_v26 = vrot.slane %v707_v57, 4 }
 0x1aa   :  { %v1012_v8 = vpop.permute.xlu2 %1011  ;;  %1163 = vrot.lane.b32.xlu1 %v645_v27, %s2452_s28  ;;  %1147 = vrot.lane.b32.xlu0 %v635_v10, %s2453_s29  ;;  %v690_v10 = vrot.slane %v683_v61, 4 }
 0x1ac   :  { %v996_v19 = vpop.permute.xlu1 %995  ;;  %v980_v37 = vpop.permute.xlu0 %979  ;;  %v691_v14 = vsel %vm122_vm0, 0.0, %v690_v10 }
 0x1ad   :  { %v2243_v40 = vsel %vm1358_vm1, %v1357_v43, %v980_v37 }
 0x1b0   :  { %1155 = vrot.lane.b32.xlu2 %v641_v47, %s2454_s30  ;;  %v723_v47 = vsel %vm122_vm0, 0.0, %v722_v26 }
 0x1b2   :  { %v1024_v6 = vpop.permute.xlu2 %1023  ;;  %1175 = vrot.lane.b32.xlu1 %v685_v21, %s2455_s2  ;;  %1159 = vrot.lane.b32.xlu0 %v651_v42, %s2456_s3  ;;  %v721_v42 = vperm.slane %v713_v32, %v1671_v24 }
 0x1b4   :  { %v1008_v29 = vpop.permute.xlu1 %1007  ;;  %v992_v53 = vpop.permute.xlu0 %991 }
 0x1b5   :  { %v1362_v49 = vsel %vm1238_vm3, %v1361_v60, %v992_v53  ;;  %vm2464_vm3 = vcmask 162816  }
 0x1b6   :  { %v1363_v50 = vsel %vm1240_vm4, %v1362_v49, %v996_v19  ;;  %vm2466_vm4 = vcmask 179200   ;;  %v728_v49 = vrot.slane %v721_v42, 4 }
 0x1b7   :  { %v1364_v55 = vsel %vm1242_vm5, %v1363_v50, %v1000_v52  ;;  %v703_v52 = vsel %vm122_vm0, 0.0, %v702_v63  ;;  %vm2469_vm5 = vcmask 195584  }
 0x1b8   :  { %1167 = vrot.lane.b32.xlu2 %v653_v45, %s2457_s4  ;;  %v711_v9 = vperm.slane %v703_v52, %v1671_v24  ;;  %v729_v45 = vsel %vm122_vm0, 0.0, %v728_v49 }
 0x1ba   :  { %v1036_v56 = vpop.permute.xlu2 %1035  ;;  %1187 = vrot.lane.b32.xlu1 %v679_v28, %s2458_s5  ;;  %1171 = vrot.lane.b32.xlu0 %v669_v16, %s2459_s6  ;;  %v727_v16 = vsel %vm122_vm0, 0.0, %v726_v20  ;;  %v724_v19 = vrot.slane %v711_v9, 4 }
 0x1bc   :  { %v1020_v48 = vpop.permute.xlu1 %1019  ;;  %v1004_v18 = vpop.permute.xlu0 %1003  ;;  %v725_v21 = vsel %vm122_vm0, 0.0, %v724_v19  ;;  %vm2485_vm0 = vcmask 408576  }
 0x1bd   :  { %v1365_v12 = vsel %vm1244_vm6, %v1364_v55, %v1004_v18  ;;  %vm2470_vm6 = vcmask 211968  }
 0x1be   :  { %v1366_v38 = vsel %vm1246_vm7, %v1365_v12, %v1008_v29  ;;  %vm2471_vm7 = vcmask 228352  }
 0x1bf   :  { %v1367_v13 = vsel %vm1248_vm8, %v1366_v38, %v1012_v8  ;;  %vm2474_vm8 = vcmask 244736  }
 0x1c0   :  { %1179 = vrot.lane.b32.xlu2 %v673_v1, %s2460_s7 }
 0x1c2   :  { %v1048_v15 = vpop.permute.xlu2 %1047  ;;  %1199 = vrot.lane.b32.xlu1 %v691_v14, %s2461_s8  ;;  %1183 = vrot.lane.b32.xlu0 %v687_v58, %s2462_s10 }
 0x1c4   :  { %v1032_v17 = vpop.permute.xlu1 %1031  ;;  %v1016_v3 = vpop.permute.xlu0 %1015 }
 0x1c5   :  { %v1368_v11 = vsel %vm2463_vm2, %v1367_v13, %v1016_v3  ;;  %vm2475_vm2 = vcmask 261120  }
 0x1c6   :  { %v1369_v31 = vsel %vm2464_vm3, %v1368_v11, %v1020_v48  ;;  %vm2476_vm3 = vcmask 277504  }
 0x1c7   :  { %v1370_v59 = vsel %vm2466_vm4, %v1369_v31, %v1024_v6  ;;  %vm2478_vm4 = vcmask 293888  }
 0x1c8   :  { %1191 = vrot.lane.b32.xlu2 %v689_v25, %s2465_s0 }
 0x1ca   :  { %v1060_v22 = vpop.permute.xlu2 %1059  ;;  %1211 = vrot.lane.b32.xlu1 %v711_v9, %s2467_s12  ;;  %1195 = vrot.lane.b32.xlu0 %v683_v61, %s2468_s13 }
 0x1cc   :  { %v1044_v5 = vpop.permute.xlu1 %1043  ;;  %v1028_v60 = vpop.permute.xlu0 %1027 }
 0x1cd   :  { %v1371_v7 = vsel %vm2469_vm5, %v1370_v59, %v1028_v60  ;;  %vm2479_vm5 = vcmask 310272  }
 0x1ce   :  { %v1372_v27 = vsel %vm2470_vm6, %v1371_v7, %v1032_v17  ;;  %vm2480_vm6 = vcmask 326656  }
 0x1cf   :  { %v1373_v43 = vsel %vm2471_vm7, %v1372_v27, %v1036_v56  ;;  %vm2481_vm7 = vcmask 343040  }
 0x1d0   :  { %1203 = vrot.lane.b32.xlu2 %v707_v57, %s1647_s9  ;;  %s2477_s9 = smov 120  }
 0x1d2   :  { %v1072_v8 = vpop.permute.xlu2 %1071  ;;  %1223 = vrot.lane.b32.xlu1 %v727_v16, %s2472_s14  ;;  %1207 = vrot.lane.b32.xlu0 %v723_v47, %s2473_s16 }
 0x1d4   :  { %v1056_v37 = vpop.permute.xlu1 %1055  ;;  %v1040_v23 = vpop.permute.xlu0 %1039 }
 0x1d5   :  { %v1374_v36 = vsel %vm2474_vm8, %v1373_v43, %v1040_v23  ;;  %vm2482_vm8 = vcmask 359424  }
 0x1d6   :  { %v1375_v41 = vsel %vm2475_vm2, %v1374_v36, %v1044_v5  ;;  %vm2483_vm2 = vcmask 375808  }
 0x1d7   :  { %v1376_v6 = vsel %vm2476_vm3, %v1375_v41, %v1048_v15  ;;  %vm2484_vm3 = vcmask 392192  }
 0x1d8   :  { %1215 = vrot.lane.b32.xlu2 %v725_v21, %s1650_s26 }
 0x1da   :  { %1219 = vrot.lane.b32.xlu0 %v717_v62, %s2477_s9  ;;  %v1084_v30 = vpop.permute.xlu2 %1083 }
 0x1dc   :  { %v1068_v44 = vpop.permute.xlu1 %1067  ;;  %v1052_v29 = vpop.permute.xlu0 %1051 }
 0x1dd   :  { %v1377_v53 = vsel %vm2478_vm4, %v1376_v6, %v1052_v29  ;;  %vm2486_vm4 = vcmask 424960  }
 0x1de   :  { %v1378_v51 = vsel %vm2479_vm5, %v1377_v53, %v1056_v37  ;;  %vm2487_vm5 = vcmask 441344  }
 0x1df   :  { %v1379_v50 = vsel %vm2480_vm6, %v1378_v51, %v1060_v22  ;;  %vm2488_vm6 = vcmask 457728  }
 0x1e0   :  { %1227 = vrot.lane.b32.xlu2 %v721_v42, %s1652_s11 }
 0x1e2   :  { %1231 = vrot.lane.b32.xlu0 %v729_v45, %s1653_s15  ;;  %v1096_v28 = vpop.permute.xlu2 %1095  ;;  %s1654_s15 = smov [#allocation5]  }
 0x1e3   :  { %s1439_s26 = sshll.u32 %s1654_s15, 4  ;;  %s1440_s26 = int_to_ptr.vmem [resolvable:$true] %s1439_s26 }
 0x1e4   :  { %v1080_v54 = vpop.permute.xlu1 %1079  ;;  %v1064_v24 = vpop.permute.xlu0 %1063 }
 0x1e5   :  { %v1380_v55 = vsel %vm2481_vm7, %v1379_v50, %v1064_v24  ;;  %vm2489_vm7 = vcmask 474112  }
 0x1e6   :  { %v1381_v61 = vsel %vm2482_vm8, %v1380_v55, %v1068_v44  ;;  %vm2490_vm8 = vcmask 490496  }
 0x1e7   :  { %v1382_v56 = vsel %vm2483_vm2, %v1381_v61, %v1072_v8  ;;  %vm2491_vm2 = vcmask 506880  }
 0x1ea   :  { %v1108_v18 = vpop.permute.xlu2 %1107 }
 0x1ec   :  { %v1092_v1 = vpop.permute.xlu1 %1091  ;;  %v1076_v48 = vpop.permute.xlu0 %1075 }
 0x1ed   :  { %v1383_v2 = vsel %vm2484_vm3, %v1382_v56, %v1076_v48  ;;  %vm2492_vm3 = vcmask 523264  }
 0x1ee   :  { %v1384_v13 = vsel %vm2485_vm0, %v1383_v2, %v1080_v54  ;;  %vm2493_vm0 = vcmask 539648  }
 0x1ef   :  { %v1385_v63 = vsel %vm2486_vm4, %v1384_v13, %v1084_v30  ;;  %vm2494_vm4 = vcmask 556032  }
 0x1f2   :  { %v1120_v12 = vpop.permute.xlu2 %1119 }
 0x1f4   :  { %v1104_v10 = vpop.permute.xlu1 %1103  ;;  %v1088_v46 = vpop.permute.xlu0 %1087 }
 0x1f5   :  { %v1386_v14 = vsel %vm2487_vm5, %v1385_v63, %v1088_v46  ;;  %vm2495_vm5 = vcmask 572416  }
 0x1f6   :  { %v1387_v58 = vsel %vm2488_vm6, %v1386_v14, %v1092_v1  ;;  %vm2496_vm6 = vcmask 588800  }
 0x1f7   :  { %v1388_v17 = vsel %vm2489_vm7, %v1387_v58, %v1096_v28  ;;  %vm2497_vm7 = vcmask 621568  }
 0x1fa   :  { %v1132_v39 = vpop.permute.xlu2 %1131 }
 0x1fc   :  { %v1116_v34 = vpop.permute.xlu1 %1115  ;;  %v1100_v38 = vpop.permute.xlu0 %1099 }
 0x1fd   :  { %v1389_v33 = vsel %vm2490_vm8, %v1388_v17, %v1100_v38  ;;  %vm2498_vm8 = vcmask 654336  }
 0x1fe   :  { %v1390_v3 = vsel %vm2491_vm2, %v1389_v33, %v1104_v10  ;;  %vm2499_vm2 = vcmask 670720  }
 0x1ff   :  { %v1391_v25 = vsel %vm2492_vm3, %v1390_v3, %v1108_v18  ;;  %vm2500_vm3 = vcmask 703488  }
 0x202   :  { %v1144_v31 = vpop.permute.xlu2 %1143 }
 0x204   :  { %v1128_v15 = vpop.permute.xlu1 %1127  ;;  %v1112_v4 = vpop.permute.xlu0 %1111 }
 0x205   :  { %v1392_v9 = vsel %vm2493_vm0, %v1391_v25, %v1112_v4  ;;  %vm2501_vm0 = vcmask 719872  }
 0x206   :  { %v1393_v59 = vsel %vm2494_vm4, %v1392_v9, %v1116_v34  ;;  %vm2503_vm4 = vcmask 752640  }
 0x207   :  { %v1394_v22 = vsel %vm2495_vm5, %v1393_v59, %v1120_v12  ;;  %vm2505_vm5 = vcmask 785408  }
 0x20a   :  { %v1156_v60 = vpop.permute.xlu2 %1155 }
 0x20c   :  { %v1140_v52 = vpop.permute.xlu1 %1139  ;;  %v1124_v11 = vpop.permute.xlu0 %1123 }
 0x20d   :  { %v1395_v5 = vsel %vm2496_vm6, %v1394_v22, %v1124_v11  ;;  %vm2507_vm6 = vcmask 818176  }
 0x20e   :  { %v1396_v20 = vsel %vm1306_vm12, %v1395_v5, %v1128_v15  ;;  %vm2502_vm12 = vcmask 736256  }
 0x20f   :  { %v1397_v7 = vsel %vm2497_vm7, %v1396_v20, %v1132_v39  ;;  %vm2508_vm7 = vcmask 834560  }
 0x212   :  { %v1168_v8 = vpop.permute.xlu2 %1167 }
 0x214   :  { %v1152_v62 = vpop.permute.xlu1 %1151  ;;  %v1136_v57 = vpop.permute.xlu0 %1135 }
 0x215   :  { %v1398_v27 = vsel %vm1310_vm10, %v1397_v7, %v1136_v57  ;;  %vm2504_vm10 = vcmask 769024  }
 0x216   :  { %v1399_v16 = vsel %vm2498_vm8, %v1398_v27, %v1140_v52  ;;  %vm2509_vm8 = vcmask 850944  }
 0x217   :  { %v1400_v47 = vsel %vm2499_vm2, %v1399_v16, %v1144_v31  ;;  %vm2510_vm2 = vcmask 867328  }
 0x21a   :  { %v1180_v41 = vpop.permute.xlu2 %1179 }
 0x21c   :  { %v1148_v26 = vpop.permute.xlu0 %1147  ;;  %v1164_v43 = vpop.permute.xlu1 %1163 }
 0x21d   :  { %v1401_v35 = vsel %vm1316_vm9, %v1400_v47, %v1148_v26  ;;  %vm2506_vm9 = vcmask 801792  }
 0x21e   :  { %v1402_v37 = vsel %vm2500_vm3, %v1401_v35, %v1152_v62  ;;  %vm2511_vm3 = vcmask 883712  }
 0x21f   :  { %v1403_v36 = vsel %vm2501_vm0, %v1402_v37, %v1156_v60  ;;  %vm2512_vm0 = vcmask 900096  }
 0x222   :  { %v1192_v53 = vpop.permute.xlu2 %1191 }
 0x224   :  { %v1160_v19 = vpop.permute.xlu0 %1159  ;;  %v1176_v23 = vpop.permute.xlu1 %1175 }
 0x225   :  { %v1404_v21 = vsel %vm2502_vm12, %v1403_v36, %v1160_v19  ;;  %vm2513_vm12 = vcmask 916480  }
 0x226   :  { %v1405_v6 = vsel %vm2503_vm4, %v1404_v21, %v1164_v43  ;;  %vm2514_vm4 = vcmask 932864  }
 0x227   :  { %v1406_v42 = vsel %vm2504_vm10, %v1405_v6, %v1168_v8  ;;  %vm2515_vm10 = vcmask 965632  }
 0x22a   :  { %v1204_v28 = vpop.permute.xlu2 %1203 }
 0x22c   :  { %v1172_v32 = vpop.permute.xlu0 %1171  ;;  %v1188_v30 = vpop.permute.xlu1 %1187 }
 0x22d   :  { %v1407_v44 = vsel %vm2505_vm5, %v1406_v42, %v1172_v32  ;;  %vm1431_vm5 = vcmp.lt.s32.totalorder %v25_v0, 256 }
 0x22e   :  { %v1408_v49 = vsel %vm2506_vm9, %v1407_v44, %v1176_v23 }
 0x22f   :  { %v1409_v51 = vsel %vm2507_vm6, %v1408_v49, %v1180_v41 }
 0x232   :  { %v1216_v10 = vpop.permute.xlu2 %1215 }
 0x234   :  { %v1184_v29 = vpop.permute.xlu0 %1183  ;;  %v1200_v45 = vpop.permute.xlu1 %1199 }
 0x235   :  { %v1410_v50 = vsel %vm2508_vm7, %v1409_v51, %v1184_v29 }
 0x236   :  { %v1411_v54 = vsel %vm2509_vm8, %v1410_v50, %v1188_v30 }
 0x237   :  { %v1412_v55 = vsel %vm2510_vm2, %v1411_v54, %v1192_v53 }
 0x23a   :  { %v1228_v14 = vpop.permute.xlu2 %1227 }
 0x23c   :  { %v1196_v24 = vpop.permute.xlu0 %1195  ;;  %v1212_v48 = vpop.permute.xlu1 %1211 }
 0x23d   :  { %v1413_v61 = vsel %vm2511_vm3, %v1412_v55, %v1196_v24 }
 0x23e   :  { %v1414_v56 = vsel %vm2512_vm0, %v1413_v61, %v1200_v45 }
 0x23f   :  { %v1415_v2 = vsel %vm2513_vm12, %v1414_v56, %v1204_v28 }
 0x244   :  { %v1208_v1 = vpop.permute.xlu0 %1207  ;;  %v1224_v13 = vpop.permute.xlu1 %1223 }
 0x245   :  { %v1416_v18 = vsel %vm2514_vm4, %v1415_v2, %v1208_v1 }
 0x246   :  { %v1417_v46 = vsel %vm1348_vm15, %v1416_v18, %v1212_v48  ;;  %vm1426_vm15 = vcmask 1040384  }
 0x247   :  { %v1418_v34 = vsel %vm2515_vm10, %v1417_v46, %v1216_v10 }
 0x24c   :  { %v1220_v12 = vpop.permute.xlu0 %1219 }
 0x24d   :  { %v1419_v38 = vsel %vm1352_vm13, %v1418_v34, %v1220_v12 }
 0x24e   :  { %v1420_v63 = vsel %vm1354_vm14, %v1419_v38, %v1224_v13 }
 0x24f   :  { %v1421_v39 = vsel %vm1356_vm11, %v1420_v63, %v1228_v14 }
 0x254   :  { %v1232_v15 = vpop.permute.xlu0 %1231 }
 0x255   :  { %v1422_v58 = vsel %vm1358_vm1, %v1421_v39, %v1232_v15 }
 0x256   :  { %v1425_v4 = vrot.slane %v1422_v58, 7 }
 0x258   :  { %v1427_v17 = vsel %vm1426_vm15, %v2243_v40, %v1425_v4 }
 0x259   :  { %1433 = vst.msk [vmem:[#allocation5] sm:$0x3] %vm1431_vm5, %v1427_v17 }
 0x25a   :  { %1444 = dma.vmem_to_hbm [thread:$0]  %s1440_s26, 32, %s1442_s18, [#allocation4]  }
 0x25b   :  { %1586 = dma.done.wait [#allocation4], 32  }
 0x25c   :  { %1587 = vsyncadd [#allocation4], 4294967264 }
 0x25d   :  { %1449 = vsyncpa [#allocation3], 1 }
 0x25e   :  { %1450 = vsyncpa [#allocation4], 1 }

</bundles_post_ra>
